<compile_context>
chip_gen: v6e
topology: v6e:2x2x1
jax: 0.10.0
libtpu: 0.0.40
codegen_flags: <defaults>
</compile_context>

<pallas_src>
import functools

import jax
import jax.numpy as jnp
from jax.experimental import pallas as pl
from jax.experimental.pallas import tpu as pltpu


_LANE = 128


def _round_up(x, m):
    return ((x + m - 1) // m) * m


def _cdiv(a, b):
    return -(-a // b)


def _mlp_kernel(x_ref, w1_ref, b1_ref, w2_ref, b2_ref, w3_ref, b3_ref, o_ref):
    """Fused FC1 -> ReLU -> FC2 -> ReLU -> FC3 for one row tile."""
    # Cast activations to the MXU compute dtype in-kernel (no HBM cast pass).
    x = x_ref[...].astype(w1_ref.dtype)                    # [tm, d_in]

    h1 = jnp.dot(x, w1_ref[...], preferred_element_type=jnp.float32)
    h1 = jnp.maximum(h1 + b1_ref[...], 0.0)                # f32 bias + ReLU

    h2 = jnp.dot(h1.astype(w2_ref.dtype), w2_ref[...],
                 preferred_element_type=jnp.float32)
    h2 = jnp.maximum(h2 + b2_ref[...], 0.0)

    h3 = jnp.dot(h2.astype(w3_ref.dtype), w3_ref[...],
                 preferred_element_type=jnp.float32)
    # Store directly in the final output dtype.
    o_ref[...] = (h3 + b3_ref[...]).astype(o_ref.dtype)


def _vmem_limit_bytes(tm, d_in, hidden_p, d_out, x_isz, out_isz, w_isz):
    """Scoped VMEM sized from the actual tiles (not a flat 32 MiB)."""
    x_tile = 2 * tm * d_in * x_isz                         # double-buffered in
    o_tile = 2 * tm * d_out * out_isz                      # double-buffered out
    weights = 2 * w_isz * (d_in * hidden_p + hidden_p * hidden_p
                           + hidden_p * d_out)             # (default) double-buf
    biases = 2 * 4 * (2 * hidden_p + d_out)
    interm = 2 * tm * hidden_p * 4                         # live f32 h1 + h2
    need = x_tile + o_tile + weights + biases + interm
    return int(min(64 << 20, max(16 << 20, 2 * need)))


@functools.partial(jax.jit, static_argnames=("row_tile", "compute_dtype"))
def feature_extracture(x, params, *, row_tile=2048, compute_dtype=jnp.bfloat16):
    """x: [..., input_size] -> [..., output_size], matching the PyTorch module.

    params: (w1, b1, w2, b2, w3, b3) with weights stored as [in_features,
    out_features] (pre-transposed vs. nn.Linear) and 1-D biases.
    """
    w1, b1, w2, b2, w3, b3 = params
    d_in, hidden = w1.shape
    d_out = w3.shape[1]

    orig_shape = x.shape
    rows = x.reshape(-1, d_in)                 # metadata-only reshape
    n = rows.shape[0]
    out_dtype = x.dtype

    # Only the hidden dim is lane-padded (weights are tiny; padding is exact:
    # padded W1 cols / b1 lanes are zero -> ReLU keeps them zero -> padded W2
    # rows / W3 rows contribute nothing).
    hidden_p = _round_up(hidden, _LANE)

    # Row tile: big (amortize per-step overhead) but capped at ceil(n/2) so
    # the parallel row axis has >= 2 steps for v7x megacore when possible.
    row_tile = max(16, _round_up(row_tile, 16))
    tm = max(16, min(row_tile, _round_up(max(_cdiv(n, 2), 1), 16)))
    grid = (_cdiv(n, tm),)                     # ragged last block handled by Pallas

    # One-time padded / cast weights and f32 biases (no activation copies).
    w1_p = (jnp.zeros((d_in, hidden_p), compute_dtype)
            .at[:, :hidden].set(w1.astype(compute_dtype)))
    w2_p = (jnp.zeros((hidden_p, hidden_p), compute_dtype)
            .at[:hidden, :hidden].set(w2.astype(compute_dtype)))
    w3_p = (jnp.zeros((hidden_p, d_out), compute_dtype)
            .at[:hidden, :].set(w3.astype(compute_dtype)))
    b1_p = jnp.zeros((1, hidden_p), jnp.float32).at[0, :hidden].set(b1.astype(jnp.float32))
    b2_p = jnp.zeros((1, hidden_p), jnp.float32).at[0, :hidden].set(b2.astype(jnp.float32))
    b3_p = b3.astype(jnp.float32).reshape(1, d_out)

    x_isz = jnp.dtype(x.dtype).itemsize
    out_isz = jnp.dtype(out_dtype).itemsize
    w_isz = jnp.dtype(compute_dtype).itemsize

    flops = 2 * n * (d_in * hidden + hidden * hidden + hidden * d_out)
    bytes_accessed = (n * d_in * x_isz + n * d_out * out_isz
                      + w_isz * (d_in * hidden_p + hidden_p * hidden_p
                                 + hidden_p * d_out)
                      + 4 * (2 * hidden_p + d_out))

    out = pl.pallas_call(
        _mlp_kernel,
        out_shape=jax.ShapeDtypeStruct((n, d_out), out_dtype),
        grid_spec=pltpu.PrefetchScalarGridSpec(
            num_scalar_prefetch=0,
            grid=grid,
            in_specs=[
                pl.BlockSpec((tm, d_in), lambda i: (i, 0)),           # x rows (true width)
                pl.BlockSpec((d_in, hidden_p), lambda i: (0, 0)),     # W1 (resident)
                pl.BlockSpec((1, hidden_p), lambda i: (0, 0)),        # b1 (f32)
                pl.BlockSpec((hidden_p, hidden_p), lambda i: (0, 0)), # W2 (resident)
                pl.BlockSpec((1, hidden_p), lambda i: (0, 0)),        # b2 (f32)
                pl.BlockSpec((hidden_p, d_out), lambda i: (0, 0)),    # W3 (resident)
                pl.BlockSpec((1, d_out), lambda i: (0, 0)),           # b3 (f32)
            ],
            out_specs=pl.BlockSpec((tm, d_out), lambda i: (i, 0)),    # true width, final dtype
        ),
        compiler_params=pltpu.CompilerParams(
            dimension_semantics=("parallel",),
            vmem_limit_bytes=_vmem_limit_bytes(
                tm, d_in, hidden_p, d_out, x_isz, out_isz, w_isz),
        ),
        cost_estimate=pl.CostEstimate(
            flops=flops, transcendentals=0, bytes_accessed=bytes_accessed),
    )(rows, w1_p, b1_p, w2_p, b2_p, w3_p, b3_p)

    return out.reshape(*orig_shape[:-1], d_out)


def init_params(key, input_size, output_size, scale=3, dtype=jnp.float32):
    """Deterministic init mimicking nn.Linear shapes; weights stored as [in, out]."""
    hidden = output_size * scale
    k1, k2, k3, k4, k5, k6 = jax.random.split(key, 6)

    def lin(kw, kb, fan_in, fan_out):
        bound = 1.0 / jnp.sqrt(fan_in)
        w = jax.random.uniform(kw, (fan_in, fan_out), dtype, -bound, bound)
        b = jax.random.uniform(kb, (fan_out,), dtype, -bound, bound)
        return w, b

    w1, b1 = lin(k1, k2, input_size, hidden)
    w2, b2 = lin(k3, k4, hidden, hidden)
    w3, b3 = lin(k5, k6, hidden, output_size)
    return (w1, b1, w2, b2, w3, b3)


def reference(x, params, compute_dtype=jnp.bfloat16):
    """Same math as the kernel (bf16 MXU operands, f32 accumulation/bias/ReLU)."""
    w1, b1, w2, b2, w3, b3 = params
    cd = compute_dtype
    h = jnp.dot(x.astype(cd), w1.astype(cd), preferred_element_type=jnp.float32) + b1
    h = jnp.maximum(h, 0.0)
    h = jnp.dot(h.astype(cd), w2.astype(cd), preferred_element_type=jnp.float32) + b2
    h = jnp.maximum(h, 0.0)
    h = jnp.dot(h.astype(cd), w3.astype(cd), preferred_element_type=jnp.float32) + b3
    return h.astype(x.dtype)


if __name__ == "__main__":
    key = jax.random.PRNGKey(0)
    kx, kp = jax.random.split(key)

    batch, seq = 2, 8
    input_size, output_size, scale = 32, 32, 3   # hidden = 96

    x = jax.random.normal(kx, (batch, seq, input_size), dtype=jnp.float32)
    params = init_params(kp, input_size, output_size, scale)

    out = feature_extracture(x, params)
    jax.block_until_ready(out)
    assert out.shape == (batch, seq, output_size)
    assert out.dtype == x.dtype

    ref = reference(x, params)
    assert jnp.allclose(out, ref, atol=2e-2, rtol=2e-2), float(
        jnp.max(jnp.abs(out - ref)))

    # Odd row count -> exercises the ragged (masked) last grid block and a
    # multi-step "parallel" grid (>= 2 steps for megacore).
    x2 = jax.random.normal(kx, (5, 77, input_size), dtype=jnp.float32)
    out2 = feature_extracture(x2, params)
    jax.block_until_ready(out2)
    ref2 = reference(x2, params)
    assert out2.shape == (5, 77, output_size)
    assert jnp.allclose(out2, ref2, atol=2e-2, rtol=2e-2), float(
        jnp.max(jnp.abs(out2 - ref2)))

    print("KERNEL_OK")
</pallas_src>

<mosaic_0001>
module attributes {stable_mosaic.version = 11 : i64} {
  func.func @_mlp_kernel(%arg0: i32, %arg1: memref<16x32xf32, #tpu.memory_space<vmem>>, %arg2: memref<32x128xbf16, #tpu.memory_space<vmem>>, %arg3: memref<1x128xf32, #tpu.memory_space<vmem>>, %arg4: memref<128x128xbf16, #tpu.memory_space<vmem>>, %arg5: memref<1x128xf32, #tpu.memory_space<vmem>>, %arg6: memref<128x32xbf16, #tpu.memory_space<vmem>>, %arg7: memref<1x32xf32, #tpu.memory_space<vmem>>, %arg8: memref<16x32xf32, #tpu.memory_space<vmem>>) attributes {dimension_semantics = [#tpu.dimension_semantics<parallel>], iteration_bounds = array<i64: 1>, scalar_prefetch = 0 : i64, scratch_operands = 0 : i64, tpu.core_type = #tpu.core_type<tc>, window_params = [{transform_indices = @transform_0, window_bounds = array<i64: 16, 32>}, {pipeline_mode = #tpu.pipeline_mode<synchronous>, transform_indices = @transform_1, window_bounds = array<i64: 32, 128>}, {pipeline_mode = #tpu.pipeline_mode<synchronous>, transform_indices = @transform_2, window_bounds = array<i64: 1, 128>}, {pipeline_mode = #tpu.pipeline_mode<synchronous>, transform_indices = @transform_3, window_bounds = array<i64: 128, 128>}, {pipeline_mode = #tpu.pipeline_mode<synchronous>, transform_indices = @transform_4, window_bounds = array<i64: 1, 128>}, {pipeline_mode = #tpu.pipeline_mode<synchronous>, transform_indices = @transform_5, window_bounds = array<i64: 128, 32>}, {pipeline_mode = #tpu.pipeline_mode<synchronous>, transform_indices = @transform_6, window_bounds = array<i64: 1, 32>}, {transform_indices = @transform_7, window_bounds = array<i64: 16, 32>}]} {
    %c0 = arith.constant 0 : index
    %c0_0 = arith.constant 0 : index
    %0 = vector.load %arg1[%c0, %c0_0] : memref<16x32xf32, #tpu.memory_space<vmem>>, vector<16x32xf32>
    %1 = arith.truncf %0 : vector<16x32xf32> to vector<16x32xbf16>
    %c0_1 = arith.constant 0 : index
    %c0_2 = arith.constant 0 : index
    %2 = vector.load %arg2[%c0_1, %c0_2] : memref<32x128xbf16, #tpu.memory_space<vmem>>, vector<32x128xbf16>
    %cst = arith.constant dense<0.000000e+00> : vector<16x128xf32>
    %3 = tpu.matmul %1, %2, %cst {dimension_numbers = #tpu.dot_dimension_numbers<[1], [0], [0], [1], [0, 0, 1, 1], [], []>} : vector<16x32xbf16>, vector<32x128xbf16>, vector<16x128xf32> -> vector<16x128xf32>
    %c0_3 = arith.constant 0 : index
    %c0_4 = arith.constant 0 : index
    %4 = vector.load %arg3[%c0_3, %c0_4] : memref<1x128xf32, #tpu.memory_space<vmem>>, vector<1x128xf32>
    %5 = vector.broadcast %4 : vector<1x128xf32> to vector<16x128xf32>
    %6 = arith.addf %3, %5 : vector<16x128xf32>
    %cst_5 = arith.constant 0.000000e+00 : f32
    %7 = vector.broadcast %cst_5 : f32 to vector<16x128xf32>
    %8 = arith.maximumf %6, %7 : vector<16x128xf32>
    %9 = arith.truncf %8 : vector<16x128xf32> to vector<16x128xbf16>
    %c0_6 = arith.constant 0 : index
    %c0_7 = arith.constant 0 : index
    %10 = vector.load %arg4[%c0_6, %c0_7] : memref<128x128xbf16, #tpu.memory_space<vmem>>, vector<128x128xbf16>
    %cst_8 = arith.constant dense<0.000000e+00> : vector<16x128xf32>
    %11 = tpu.matmul %9, %10, %cst_8 {dimension_numbers = #tpu.dot_dimension_numbers<[1], [0], [0], [1], [0, 0, 1, 1], [], []>} : vector<16x128xbf16>, vector<128x128xbf16>, vector<16x128xf32> -> vector<16x128xf32>
    %c0_9 = arith.constant 0 : index
    %c0_10 = arith.constant 0 : index
    %12 = vector.load %arg5[%c0_9, %c0_10] : memref<1x128xf32, #tpu.memory_space<vmem>>, vector<1x128xf32>
    %13 = vector.broadcast %12 : vector<1x128xf32> to vector<16x128xf32>
    %14 = arith.addf %11, %13 : vector<16x128xf32>
    %cst_11 = arith.constant 0.000000e+00 : f32
    %15 = vector.broadcast %cst_11 : f32 to vector<16x128xf32>
    %16 = arith.maximumf %14, %15 : vector<16x128xf32>
    %17 = arith.truncf %16 : vector<16x128xf32> to vector<16x128xbf16>
    %c0_12 = arith.constant 0 : index
    %c0_13 = arith.constant 0 : index
    %18 = vector.load %arg6[%c0_12, %c0_13] : memref<128x32xbf16, #tpu.memory_space<vmem>>, vector<128x32xbf16>
    %cst_14 = arith.constant dense<0.000000e+00> : vector<16x32xf32>
    %19 = tpu.matmul %17, %18, %cst_14 {dimension_numbers = #tpu.dot_dimension_numbers<[1], [0], [0], [1], [0, 0, 1, 1], [], []>} : vector<16x128xbf16>, vector<128x32xbf16>, vector<16x32xf32> -> vector<16x32xf32>
    %c0_15 = arith.constant 0 : index
    %c0_16 = arith.constant 0 : index
    %20 = vector.load %arg7[%c0_15, %c0_16] : memref<1x32xf32, #tpu.memory_space<vmem>>, vector<1x32xf32>
    %21 = vector.broadcast %20 : vector<1x32xf32> to vector<16x32xf32>
    %22 = arith.addf %19, %21 : vector<16x32xf32>
    %c0_17 = arith.constant 0 : index
    %c0_18 = arith.constant 0 : index
    %23 = vector.load %arg8[%c0_17, %c0_18] : memref<16x32xf32, #tpu.memory_space<vmem>>, vector<16x32xf32>
    tpu.vector_store %arg8[%c0_17, %c0_18], %22 {strides = array<i32>} : memref<16x32xf32, #tpu.memory_space<vmem>>, vector<16x32xf32>,
    return
  }
  func.func @transform_0(%arg0: i32) -> (i32, i32) {
    %c0_i32 = arith.constant 0 : i32
    %c0_i32_0 = arith.constant 0 : i32
    return %arg0, %c0_i32 : i32, i32
  }
  func.func @transform_1(%arg0: i32) -> (i32, i32) {
    %c0_i32 = arith.constant 0 : i32
    %c0_i32_0 = arith.constant 0 : i32
    %c0_i32_1 = arith.constant 0 : i32
    return %c0_i32, %c0_i32_0 : i32, i32
  }
  func.func @transform_2(%arg0: i32) -> (i32, i32) {
    %c0_i32 = arith.constant 0 : i32
    %c0_i32_0 = arith.constant 0 : i32
    %c0_i32_1 = arith.constant 0 : i32
    return %c0_i32, %c0_i32_0 : i32, i32
  }
  func.func @transform_3(%arg0: i32) -> (i32, i32) {
    %c0_i32 = arith.constant 0 : i32
    %c0_i32_0 = arith.constant 0 : i32
    %c0_i32_1 = arith.constant 0 : i32
    return %c0_i32, %c0_i32_0 : i32, i32
  }
  func.func @transform_4(%arg0: i32) -> (i32, i32) {
    %c0_i32 = arith.constant 0 : i32
    %c0_i32_0 = arith.constant 0 : i32
    %c0_i32_1 = arith.constant 0 : i32
    return %c0_i32, %c0_i32_0 : i32, i32
  }
  func.func @transform_5(%arg0: i32) -> (i32, i32) {
    %c0_i32 = arith.constant 0 : i32
    %c0_i32_0 = arith.constant 0 : i32
    %c0_i32_1 = arith.constant 0 : i32
    return %c0_i32, %c0_i32_0 : i32, i32
  }
  func.func @transform_6(%arg0: i32) -> (i32, i32) {
    %c0_i32 = arith.constant 0 : i32
    %c0_i32_0 = arith.constant 0 : i32
    %c0_i32_1 = arith.constant 0 : i32
    return %c0_i32, %c0_i32_0 : i32, i32
  }
  func.func @transform_7(%arg0: i32) -> (i32, i32) {
    %c0_i32 = arith.constant 0 : i32
    %c0_i32_0 = arith.constant 0 : i32
    return %arg0, %c0_i32 : i32, i32
  }
}

</mosaic_0001>

<bundles_post_ra>
// kernel: feature_extracture.1
= control target key start
LH: loop header
LB: loop body
LE: loop exit
PB: predicated region body
PF: predicated region fallthrough
CT: control target
= control target key end

     0   :  { %v483_v1 = vmov 0.0   ;;  %vm484_vm0 = vmmov 0   ;;  %vm54_vm1 = vcmask 261120   ;;  %s627_s0 = inlined_call_operand.vmem [shape: f32[16,32], index: 0, kind: input, shape index: {}]   ;;  %s628_s1 = inlined_call_operand.vmem [shape: bf16[32,128], index: 1, kind: input, shape index: {}]   ;;  %s629_s2 = inlined_call_operand.vmem [shape: f32[1,128], index: 2, kind: input, shape index: {}]   ;;  %s630_s3 = inlined_call_operand.vmem [shape: bf16[128,128], index: 3, kind: input, shape index: {}]   ;;  %s631_s4 = inlined_call_operand.vmem [shape: f32[1,128], index: 4, kind: input, shape index: {}]   ;;  %s632_s5 = inlined_call_operand.vmem [shape: bf16[128,32], index: 5, kind: input, shape index: {}]   ;;  %s633_s6 = inlined_call_operand.vmem [shape: f32[1,32], index: 6, kind: input, shape index: {}]   ;;  %s634_s7 = inlined_call_operand.hbm [shape: f32[16,32], index: 7, kind: output, shape index: {}]  }
   0x1   :  { %v443_v0 = vld [vmem:[%s628_s1 + $0x8] sm:$0xff]   ;;  %390 = vmatprep.subr.bf16.mxu0 %v483_v1  ;;  %v444_v2 = vld [vmem:[%s628_s1] sm:$0xff]   ;;  %398 = vmatprep.subr.bf16.mxu1 %v483_v1  ;;  %v445_v5 = vld [vmem:[%s630_s3 + $0x38] sm:$0xff]  }
   0x2   :  { %391 = vmatpush3.bf16.msra.mxu0 %v443_v0  ;;  %394 = vmatprep.mubr.msk.bf16.mxu0 %vm484_vm0, %v483_v1  ;;  %v28_v3 = vld [vmem:[%s627_s0] sm:$0xff]  ;;  %v29_v4 = vld [vmem:[%s627_s0 + $0x8] sm:$0xff]  ;;  %v446_v7 = vld [vmem:[%s630_s3 + $0x30] sm:$0xff]  }
   0x3   :  { %392 = vmatprep.subr.bf16.mxu0 %v483_v1  ;;  %414 = vmatprep.mubr.msk.bf16.mxu1 %vm484_vm0, %v483_v1  ;;  %v30_v6 = vpack.c.bf16 %v29_v4, %v28_v3  ;;  %v447_v8 = vld [vmem:[%s630_s3 + $0x28] sm:$0xff]   ;;  %v448_v9 = vld [vmem:[%s630_s3 + $0x20] sm:$0xff]  }
   0x4   :  { %399 = vmatpush3.bf16.msra.mxu1 %v445_v5 }
   0x5   :  { %400 = vmatprep.subr.bf16.mxu1 %v483_v1 }
   0x6   :  { %393 = vmatpush3.bf16.msra.mxu0 %v444_v2 }
   0x7   :  { %418 = vmatprep.subr.bf16.mxu0 %v483_v1 }
   0x8   :  { %401 = vmatpush3.bf16.msra.mxu1 %v446_v7 }
   0x9   :  { %395 = vmatmul.mubr.msk.bf16.vlgmr.msra.gmra.mxu0 %vm54_vm1, %v30_v6  ;;  %402 = vmatprep.subr.bf16.mxu1 %v483_v1 }
   0xa   :  { %434 = vmatprep.mubr.msk.bf16.mxu0 %vm484_vm0, %v483_v1 }
   0xc   :  { %403 = vmatpush3.bf16.msra.mxu1 %v447_v8 }
   0xd   :  { %404 = vmatprep.subr.bf16.mxu1 %v483_v1 }
   0xe   :  { %12 = vsyncpa [#allocation3], 0  ;;  %v449_v10 = vld [vmem:[%s630_s3 + $0x18] sm:$0xff]   ;;  %v450_v11 = vld [vmem:[%s630_s3 + $0x10] sm:$0xff]  }
   0xf   :  { %v451_v12 = vld [vmem:[%s630_s3 + $0x8] sm:$0xff]   ;;  %v452_v13 = vld [vmem:[%s630_s3] sm:$0xff]   ;;  %v453_v14 = vld [vmem:[%s632_s5 + $0x38] sm:$0xff]  }
  0x10   :  { %405 = vmatpush3.bf16.msra.mxu1 %v448_v9  ;;  %419 = vmatpush3.bf16.msra.mxu0 %v453_v14  ;;  %v454_v15 = vld [vmem:[%s632_s5 + $0x30] sm:$0xff]   ;;  %v455_v16 = vld [vmem:[%s632_s5 + $0x28] sm:$0xff]   ;;  %v456_v17 = vld [vmem:[%s632_s5 + $0x20] sm:$0xff]  }
  0x11   :  { %406 = vmatprep.subr.bf16.mxu1 %v483_v1  ;;  %420 = vmatprep.subr.bf16.mxu0 %v483_v1  ;;  %v457_v18 = vld [vmem:[%s632_s5 + $0x18] sm:$0xff]   ;;  %v347_v19 = vld [vmem:[%s629_s2] ss:$0 sm:$0xff]  ;;  %v458_v29 = vld [vmem:[%s632_s5 + $0x10] sm:$0xff]  }
  0x12   :  { %v459_v30 = vld [vmem:[%s632_s5 + $0x8] sm:$0xff]   ;;  %v460_v31 = vld [vmem:[%s632_s5] sm:$0xff]   ;;  %s485_s5 = smov [#allocation2]  }
  0x13   :  { %v351_v32 = vld [vmem:[%s631_s4] ss:$0 sm:$0xff]  ;;  %s336_s18 = sshll.u32 %s485_s5, 4  ;;  %s337_s18 = int_to_ptr.vmem [resolvable:$true] %s336_s18 }
  0x14   :  { %407 = vmatpush3.bf16.msra.mxu1 %v449_v10  ;;  %421 = vmatpush3.bf16.msra.mxu0 %v454_v15  ;;  %v360_v42 = vld [vmem:[%s633_s6] ss:$0 sm:$0xff]  ;;  %s461_s4 = scalar_lea.vmem %s337_s18, 256  ;;  %p466_p1 = scmp.lt.s32.totalorder %s337_s18, %s337_s18 }
  0x15   :  { %408 = vmatprep.subr.bf16.mxu1 %v483_v1  ;;  %422 = vmatprep.subr.bf16.mxu0 %v483_v1  ;;  %p462_p0 = scmp.ne.s32.totalorder %s337_s18, %s461_s4  ;;  %p467_p2 = scmp.lt.s32.totalorder %s461_s4, %s461_s4 }
  0x17   :  { %p468_p3 = por %p467_p2, %p466_p1 }
  0x18   :  { %409 = vmatpush3.bf16.msra.mxu1 %v450_v11  ;;  %423 = vmatpush3.bf16.msra.mxu0 %v455_v16 }
  0x19   :  { %410 = vmatprep.subr.bf16.mxu1 %v483_v1  ;;  %424 = vmatprep.subr.bf16.mxu0 %v483_v1  ;;  %p469_p4 = pnand %p468_p3, %p462_p0 }
  0x1c   :  { %411 = vmatpush3.bf16.msra.mxu1 %v451_v12  ;;  %425 = vmatpush3.bf16.msra.mxu0 %v456_v17 }
  0x1d   :  { %412 = vmatprep.subr.bf16.mxu1 %v483_v1  ;;  %426 = vmatprep.subr.bf16.mxu0 %v483_v1 }
  0x20   :  { %413 = vmatpush3.bf16.msra.mxu1 %v452_v13  ;;  %427 = vmatpush3.bf16.msra.mxu0 %v457_v18 }
  0x21   :  { %428 = vmatprep.subr.bf16.mxu0 %v483_v1 }
  0x24   :  { %429 = vmatpush3.bf16.msra.mxu0 %v458_v29 }
  0x25   :  { %430 = vmatprep.subr.bf16.mxu0 %v483_v1 }
  0x28   :  { %431 = vmatpush3.bf16.msra.mxu0 %v459_v30 }
  0x29   :  { %432 = vmatprep.subr.bf16.mxu0 %v483_v1 }
  0x2c   :  { %433 = vmatpush3.bf16.msra.mxu0 %v460_v31 }
  0xc9   :  { %v92_v20 = vpop.f32.mrf.mxu0 }
  0xca   :  { %v93_v22 = vadd.f32 %v347_v19, %v92_v20 }
  0xcb   :  { %v396_v21 = vpop.f32.mrf.mxu0 }
  0xcc   :  { %v99_v26 = vmax.f32 %v93_v22, 0.0 }
  0xcd   :  { %v95_v23 = vpop.f32.mrf.mxu0 }
  0xce   :  { %v96_v24 = vadd.f32 %v347_v19, %v95_v23 }
  0xcf   :  { %v397_v25 = vpop.f32.mrf.mxu0 }
  0xd0   :  { %v100_v27 = vmax.f32 %v96_v24, 0.0 }
  0xd2   :  { %v101_v28 = vpack.c.bf16 %v100_v27, %v99_v26 }
  0xd4   :  { %415 = vmatmul.mubr.bf16.vlgmr.msra.gmra.mxu1 %v101_v28 }
 0x194   :  { %v207_v33 = vpop.f32.mrf.mxu1 }
 0x195   :  { %v208_v35 = vadd.f32 %v351_v32, %v207_v33 }
 0x196   :  { %v416_v34 = vpop.f32.mrf.mxu1 }
 0x197   :  { %v214_v39 = vmax.f32 %v208_v35, 0.0 }
 0x198   :  { %v210_v36 = vpop.f32.mrf.mxu1 }
 0x199   :  { %v211_v37 = vadd.f32 %v351_v32, %v210_v36 }
 0x19a   :  { %v417_v38 = vpop.f32.mrf.mxu1 }
 0x19b   :  { %v215_v40 = vmax.f32 %v211_v37, 0.0 }
 0x19d   :  { %v216_v41 = vpack.c.bf16 %v215_v40, %v214_v39 }
 0x19f   :  { %435 = vmatmul.mubr.bf16.vlgmr.msra.gmra.mxu0 %v216_v41 }
 0x25f   :  { %v322_v43 = vpop.f32.mrf.mxu0 }
 0x260   :  { %v323_v44 = vadd.f32 %v360_v42, %v322_v43 }
 0x261   :  { %v436_v45 = vpop.f32.mrf.mxu0 }
 0x262   :  { %329 = vst.msk [vmem:[#allocation2] sm:$0xff] %vm54_vm1, %v323_v44 }
 0x263   :  { %v325_v46 = vpop.f32.mrf.mxu0 }
 0x264   :  { %v326_v47 = vadd.f32 %v360_v42, %v325_v46 }
 0x265   :  { %v437_v48 = vpop.f32.mrf.mxu0 }
 0x266   :  { %330 = vst.msk [vmem:[#allocation2 + $0x8] sm:$0xff] %vm54_vm1, %v326_v47 }
 0x267   :  { %472 = shalt.err (!%p469_p4)
}
 0x268   :  { %s486_s6 = smov 128   ;;  %s487_s19 = smov 8  }
 0x269   :  { %342 = dma.vmem_to_hbm [thread:$0]  %s337_s18, 256, %s634_s7, [#allocation3], %s486_s6, %s486_s6, %s487_s19  }
 0x26a   :  { %481 = dma.done.wait [#allocation3], 256  }
 0x26b   :  { %482 = vsyncadd [#allocation3], 4294967040 }
 0x26c   :  { %346 = vsyncpa [#allocation3], 1 }

</bundles_post_ra>
